<compile_context>
chip_gen: v7x
topology: tpu7x:2x2x1
jax: 0.10.0
libtpu: 0.0.40
codegen_flags: <defaults>
</compile_context>

<pallas_src>
import functools

import jax
import jax.numpy as jnp
from jax.experimental import pallas as pl
from jax.experimental.pallas import tpu as pltpu


def _dropedge_kernel(seed_ref, adj_ref, out_ref, *, p, n):
    i = pl.program_id(0)
    tile_rows, full_n = out_ref.shape

    # Global row / column indices of this (TILE_R, N) row block.
    rows = jax.lax.broadcasted_iota(jnp.int32, (tile_rows, full_n), 0) + i * tile_rows
    cols = jax.lax.broadcasted_iota(jnp.int32, (tile_rows, full_n), 1)

    # ---- counter-based per-element RNG: splitmix32 finalizer ---------------
    seed_u = seed_ref[0].astype(jnp.uint32)
    idx = rows.astype(jnp.uint32) * jnp.uint32(n) + cols.astype(jnp.uint32)
    h = idx + seed_u * jnp.uint32(0x9E3779B9)
    h = h ^ (h >> 16)
    h = h * jnp.uint32(0x7FEB352D)
    h = h ^ (h >> 15)
    h = h * jnp.uint32(0x846CA68B)
    h = h ^ (h >> 16)

    # Integer-threshold Bernoulli: drop with probability p (no float convert).
    threshold = jnp.uint32(min(int(round(p * 2.0**32)), 0xFFFFFFFF))
    keep = h >= threshold

    # ---- dropout(adj - I) + I ----------------------------------------------
    eye = (rows == cols).astype(jnp.float32)
    x = adj_ref[...].astype(jnp.float32) - eye
    scale = jnp.float32(1.0 / (1.0 - p))
    out = jnp.where(keep, x * scale, jnp.float32(0.0)) + eye
    out_ref[...] = out.astype(out_ref.dtype)


def _pick_tile_rows(n, itemsize, target_block_bytes=4 << 20):
    """Largest multiple-of-8 row count dividing n with block <= target bytes."""
    bytes_per_row = max(1, n * itemsize)
    target = max(8, target_block_bytes // bytes_per_row)
    if n >= 16:
        # Keep at least 2 grid steps so both v7x TensorCores get work.
        target = min(target, max(8, n // 2))
    best = None
    r = 8
    while r <= min(n, target):
        if n % r == 0:
            best = r
        r += 8
    if best is None:
        best = n  # fall back to a single full-array block
    return best


def drop_edge(adj, seed, p=0.3, tile_rows=None):
    """Pallas implementation of DropEdge.forward (training mode)."""
    n = adj.shape[0]
    assert adj.shape == (n, n)
    itemsize = jnp.dtype(adj.dtype).itemsize

    if tile_rows is None:
        tile_rows = _pick_tile_rows(n, itemsize)
    assert n % tile_rows == 0, "N must be a multiple of tile_rows"
    grid = (n // tile_rows,)

    block_bytes = tile_rows * n * itemsize
    # in + out, double-buffered, plus headroom; clamp for v5e/v7x VMEM budgets.
    vmem_limit = int(min(48 << 20, max(16 << 20, 4 * block_bytes + (2 << 20))))

    seed_arr = jnp.asarray([seed], dtype=jnp.int32)

    return pl.pallas_call(
        functools.partial(_dropedge_kernel, p=float(p), n=int(n)),
        out_shape=jax.ShapeDtypeStruct((n, n), adj.dtype),
        grid_spec=pltpu.PrefetchScalarGridSpec(
            num_scalar_prefetch=1,
            grid=grid,
            in_specs=[pl.BlockSpec((tile_rows, n), lambda i, seed: (i, 0))],
            out_specs=pl.BlockSpec((tile_rows, n), lambda i, seed: (i, 0)),
        ),
        compiler_params=pltpu.CompilerParams(
            dimension_semantics=("parallel",),
            vmem_limit_bytes=vmem_limit,
        ),
        cost_estimate=pl.CostEstimate(
            flops=8 * n * n,
            transcendentals=0,
            bytes_accessed=2 * n * n * itemsize,
        ),
    )(seed_arr, adj)


if __name__ == "__main__":
    key = jax.random.PRNGKey(0)
    N = 256          # small synthetic graph
    P = 0.3

    # Deterministic synthetic adjacency matrix (symmetric, with self loops).
    adj = (jax.random.uniform(key, (N, N), dtype=jnp.float32) < 0.2).astype(
        jnp.float32
    )
    adj = jnp.maximum(adj, adj.T)
    adj = adj.at[jnp.arange(N), jnp.arange(N)].set(1.0)

    out = drop_edge(adj, seed=42, p=P)
    out = jax.block_until_ready(out)

    # Sanity checks.
    assert out.shape == adj.shape and out.dtype == adj.dtype
    # Diagonal: dropout(1 - 1) + 1 == 1 exactly.
    assert bool(jnp.all(jnp.diag(out) == 1.0))
    # Off-diagonal entries are either dropped (0) or scaled by 1/(1-p).
    offdiag_out = out - jnp.diag(jnp.diag(out))
    offdiag_adj = adj - jnp.diag(jnp.diag(adj))
    ok = (offdiag_out == 0.0) | (
        jnp.abs(offdiag_out - offdiag_adj / (1.0 - P)) < 1e-5
    )
    assert bool(jnp.all(ok))
    # Keep fraction is roughly 1 - p.
    n_edges = float(jnp.sum(offdiag_adj > 0))
    n_kept = float(jnp.sum(offdiag_out > 0))
    frac = n_kept / max(n_edges, 1.0)
    assert 0.5 < frac < 0.9, frac

    print("KERNEL_OK")
</pallas_src>

<mosaic_0001>
module attributes {stable_mosaic.version = 11 : i64} {
  func.func @_dropedge_kernel(%arg0: i32, %arg1: memref<1xi32, #tpu.memory_space<smem>>, %arg2: memref<128x256xf32, #tpu.memory_space<vmem>>, %arg3: memref<128x256xf32, #tpu.memory_space<vmem>>) attributes {dimension_semantics = [#tpu.dimension_semantics<parallel>], iteration_bounds = array<i64: 2>, scalar_prefetch = 1 : i64, scratch_operands = 0 : i64, tpu.core_type = #tpu.core_type<tc>, window_params = [{transform_indices = @transform_0, window_bounds = array<i64: 128, 256>}, {transform_indices = @transform_1, window_bounds = array<i64: 128, 256>}]} {
    %0 = tpu.iota {dimensions = array<i32: 0>} : vector<128x256xi32>
    %c128_i32 = arith.constant 128 : i32
    %1 = arith.muli %arg0, %c128_i32 : i32
    %2 = vector.broadcast %1 : i32 to vector<128x256xi32>
    %3 = arith.addi %0, %2 : vector<128x256xi32>
    %4 = tpu.iota {dimensions = array<i32: 1>} : vector<128x256xi32>
    %c0 = arith.constant 0 : index
    %5 = memref.load %arg1[%c0] : memref<1xi32, #tpu.memory_space<smem>>
    %c256_i32 = arith.constant 256 : i32
    %6 = vector.broadcast %c256_i32 : i32 to vector<128x256xi32>
    %7 = arith.muli %3, %6 : vector<128x256xi32>
    %8 = arith.addi %7, %4 : vector<128x256xi32>
    %c-1640531527_i32 = arith.constant -1640531527 : i32
    %9 = arith.muli %5, %c-1640531527_i32 : i32
    %10 = vector.broadcast %9 : i32 to vector<128x256xi32>
    %11 = arith.addi %8, %10 : vector<128x256xi32>
    %c16_i32 = arith.constant 16 : i32
    %12 = vector.broadcast %c16_i32 : i32 to vector<128x256xi32>
    %13 = arith.shrui %11, %12 : vector<128x256xi32>
    %14 = arith.xori %11, %13 : vector<128x256xi32>
    %c2146121005_i32 = arith.constant 2146121005 : i32
    %15 = vector.broadcast %c2146121005_i32 : i32 to vector<128x256xi32>
    %16 = arith.muli %14, %15 : vector<128x256xi32>
    %c15_i32 = arith.constant 15 : i32
    %17 = vector.broadcast %c15_i32 : i32 to vector<128x256xi32>
    %18 = arith.shrui %16, %17 : vector<128x256xi32>
    %19 = arith.xori %16, %18 : vector<128x256xi32>
    %c-2073254261_i32 = arith.constant -2073254261 : i32
    %20 = vector.broadcast %c-2073254261_i32 : i32 to vector<128x256xi32>
    %21 = arith.muli %19, %20 : vector<128x256xi32>
    %c16_i32_0 = arith.constant 16 : i32
    %22 = vector.broadcast %c16_i32_0 : i32 to vector<128x256xi32>
    %23 = arith.shrui %21, %22 : vector<128x256xi32>
    %24 = arith.xori %21, %23 : vector<128x256xi32>
    %c1288490189_i32 = arith.constant 1288490189 : i32
    %25 = vector.broadcast %c1288490189_i32 : i32 to vector<128x256xi32>
    %26 = arith.cmpi uge, %24, %25 : vector<128x256xi32>
    %27 = arith.cmpi eq, %3, %4 : vector<128x256xi32>
    %28 = arith.extui %27 : vector<128x256xi1> to vector<128x256xi32>
    %29 = arith.sitofp %28 : vector<128x256xi32> to vector<128x256xf32>
    %c0_1 = arith.constant 0 : index
    %c0_2 = arith.constant 0 : index
    %30 = vector.load %arg2[%c0_1, %c0_2] : memref<128x256xf32, #tpu.memory_space<vmem>>, vector<128x256xf32>
    %31 = arith.subf %30, %29 : vector<128x256xf32>
    %cst = arith.constant 1.42857146 : f32
    %32 = vector.broadcast %cst : f32 to vector<128x256xf32>
    %33 = arith.mulf %31, %32 : vector<128x256xf32>
    %cst_3 = arith.constant 0.000000e+00 : f32
    %34 = vector.broadcast %cst_3 : f32 to vector<128x256xf32>
    %35 = arith.select %26, %33, %34 : vector<128x256xi1>, vector<128x256xf32>
    %36 = arith.addf %35, %29 : vector<128x256xf32>
    %c0_4 = arith.constant 0 : index
    %c0_5 = arith.constant 0 : index
    %37 = vector.load %arg3[%c0_4, %c0_5] : memref<128x256xf32, #tpu.memory_space<vmem>>, vector<128x256xf32>
    tpu.vector_store %arg3[%c0_4, %c0_5], %36 {strides = array<i32>} : memref<128x256xf32, #tpu.memory_space<vmem>>, vector<128x256xf32>,
    return
  }
  func.func @transform_0(%arg0: i32, %arg1: memref<1xi32, #tpu.memory_space<smem>>) -> (i32, i32) {
    %c0_i32 = arith.constant 0 : i32
    %c0_i32_0 = arith.constant 0 : i32
    return %arg0, %c0_i32 : i32, i32
  }
  func.func @transform_1(%arg0: i32, %arg1: memref<1xi32, #tpu.memory_space<smem>>) -> (i32, i32) {
    %c0_i32 = arith.constant 0 : i32
    %c0_i32_0 = arith.constant 0 : i32
    return %arg0, %c0_i32 : i32, i32
  }
}

</mosaic_0001>

<bundles_post_ra>
// kernel: tpu_custom_call.1
= control target key start
LH: loop header
LB: loop body
LE: loop exit
PB: predicated region body
PF: predicated region fallthrough
CT: control target
= control target key end

     0   :  { %s1722_s0 = inlined_call_operand.<no memory space> [shape: s32[1], index: 0, kind: input, shape index: {}]   ;;  %s1723_s1 = inlined_call_operand.hbm [shape: f32[256,256], index: 1, kind: input, shape index: {}]   ;;  %s1724_s2 = inlined_call_operand.hbm [shape: f32[256,256], index: 2, kind: output, shape index: {}]  }
   0x1   :  { %7 = sst [smem:[#allocation3]] %s1722_s0 }
   0x2   :  { %8 = vsyncpa [#allocation5], 0 }
   0x3   :  { %10 = vsyncpa [#allocation5 + $0x1], 0 }
   0x4   :  { %11 = vsyncpa [#allocation6], 0 }
   0x5   :  { %13 = vsyncpa [#allocation6 + $0x1], 0  ;;  %s1152_s11 = smov 0   ;;  %s1154_s12 = smov 0  }
   0x6   :  { %s1156_s13 = smov 0   ;;  %s1158_s14 = smov 0  }
   0x7 LB: > { %s1173_s0 = sadd.s32 4294967295, %s1125_s14   ;;  %s925_s15 = sadd.s32 4294967294, %s1125_s14   ;;  %s1125_s14 = sphi %s1158_s14, %s1737_s14   ;;  %s1121_s13 = sphi %s1156_s13, %s1736_s13   ;;  %s1117_s12 = sphi %s1154_s12, %s1735_s12   ;;  %s1113_s11 = sphi %s1152_s11, %s1734_s11  }
   0x8   : > { %s1177_s16 = sadd.s32 1, %s1125_s14   ;;  %s26_s17 = sadd.s32 1, %s1121_s13 }
   0x9   : > { %s23_s18 = ssub.s32 %s1125_s14, %s1177_s16  ;;  %p33_p0 = scmp.ne.s32.totalorder %s1121_s13, %s1117_s12 }
   0xa   : > { %p24_p1 = scmp.eq.s32.totalorder %s23_s18, 0  ;;  %p34_p2 = scmp.eq.s32.totalorder %s1125_s14, 0 }
   0xb   : > { %p39_p3 = scmp.ne.s32.totalorder %s1117_s12, %s1113_s11  ;;  %p40_p4 = scmp.eq.s32.totalorder %s1173_s0, 0 }
   0xc   : > { %s1189_s19 = scalar_select %p24_p1, %s1121_s13, %s26_s17  }
   0xd   : > { %p1191_p5 = por %p34_p2, %p33_p0  ;;  %p1195_p6 = por %p40_p4, %p39_p3 }
   0xe   : > { %p63_p7 = scmp.eq.s32.totalorder %s1173_s0, 1  ;;  %p69_p8 = scmp.eq.s32.totalorder %s925_s15, 1 }
   0xf   : > { %p990_p10 = scmp.lt.s32.totalorder %s1125_s14, 2  ;;  %s89_s24 = sand.u32 1, %s1121_s13  }
  0x10   : > { %p1202_p11 = por %p63_p7, %p33_p0  ;;  %p1206_p12 = por %p69_p8, %p39_p3 }
  0x11   : > { %s975_s25 = sshll.u32 %s1125_s14, 12  ;;  %s928_s26 = sshll.u32 %s89_s24, 8 }
  0x12   : > { %s1728_s22 = scalar_select %p1202_p11, 1, 0 }
  0x13   : > { %s1729_s23 = scalar_select %p1206_p12, 1, 0 }
  0x14   : > { %s1215_s29 = scalar_lea.hbm %s1723_s1, %s975_s25  ;;  %s93_s30 = scalar_lea.vmem [#allocation4], %s928_s26 }
  0x15   : > { %s101_s3 = sshll.u32 %s93_s30, 4  ;;  %p1219_p13 = pnand %p990_p10, %p1191_p5  ;;  %s1223_s3 = int_to_ptr.vmem [resolvable:$true] %s101_s3 }
  0x16   : > { %s1225_s5 = scalar_lea.sflag [#allocation5], %s89_s24  ;;  %s1029_s6 = scalar_lea.hbm %s1215_s29, 4096 }
  0x17   : > { %p1030_p0 = scmp.ne.s32.totalorder %s1215_s29, %s1029_s6  ;;  %p1031_p1 = pneg %p1219_p13 }
  0x18   : > { %s1034_s9 = scalar_lea.hbm %s1723_s1, 8192  ;;  %p1035_p4 = scmp.lt.u32.totalorder %s1215_s29, %s1723_s1 }
  0x19   : > { %p1032_p2 = pnand %p1031_p1, %p1030_p0  ;;  %p1036_p5 = scmp.lt.u32.totalorder %s1034_s9, %s1029_s6 }
  0x1a   : > { %p1038_p8 = scmp.lt.u32.totalorder %s1029_s6, %s1215_s29 }
  0x1b   : > { %p1033_p3 = pneg %p1032_p2  ;;  %p1037_p7 = por %p1036_p5, %p1035_p4 }
  0x1d   : > { %p1039_p10 = por %p1038_p8, %p1037_p7 }
  0x1f   : > { %p1040_p9 = pnand %p1039_p10, %p1033_p3 }
  0x21   : > { %1043 = shalt.err (!%p1040_p9)
}
  0x22   : > { %s1044_s17 = scalar_lea.vmem %s1223_s3, 4096  ;;  %s1127_s18 = smov [#allocation4]  }
  0x23   : > { %p1045_p0 = scmp.ne.s32.totalorder %s1223_s3, %s1044_s17  ;;  %s1049_s20 = sshll.u32 %s1127_s18, 4  ;;  %s1050_s20 = int_to_ptr.vmem [resolvable:$false] %s1049_s20 }
  0x24   : > { %s1051_s24 = scalar_lea.vmem %s1050_s20, 8192  ;;  %p1052_p11 = scmp.lt.s32.totalorder %s1223_s3, %s1050_s20 }
  0x25   : > { %p1047_p2 = pnand %p1045_p0, %p1031_p1  ;;  %p1053_p4 = scmp.lt.s32.totalorder %s1051_s24, %s1044_s17 }
  0x27   : > { %p1048_p12 = pneg %p1047_p2  ;;  %p1054_p5 = por %p1053_p4, %p1052_p11 }
  0x29   : > { %p1055_p7 = pnand %p1054_p5, %p1048_p12 }
  0x2b   : > { %1058 = shalt.err (!%p1055_p7)
}
  0x2c   : > { %s1128_s25 = smov 256   ;;  %s1129_s26 = smov 16  }
  0x2d   : > { %985 = dma.hbm_to_vmem [thread:$0]  (!%p1219_p13), %s1215_s29, 4096, %s1223_s3, %s1225_s5, %s1128_s25, %s1128_s25, %s1129_s26  }
  0x2e   : > { %p932_p9 = scmp.ge.s32.totalorder %s1125_s14, 1  ;;  %p109_p1 = scmp.lt.s32.totalorder %s1125_s14, 3 }
  0x30   : > { %p110_p3 = pnand %p932_p9, %p109_p1 }
  0x31   : > { %s1256_s27 = sand.u32 (!%p110_p3), 1, %s1117_s12  }
  0x32   : > { %113 = sbr.rel (%p110_p3) target bundleno = 232 (0xe8), region = 24  ;;  %s933_s28 = sshll.u32 (!%p110_p3), %s1256_s27, 8 }
  0x33   : > { %s116_s30 = scalar_lea.sflag (!%p110_p3), [#allocation5], %s1256_s27  ;;  %s1262_s6 = scalar_lea.vmem (!%p110_p3), [#allocation4], %s933_s28 }
  0x39   : > { %1104 = dma.done.wait (%p1195_p6), %s116_s30, 4096  }
  0x3a   : > { %1106 = vsyncadd (%p1195_p6), %s116_s30, 4294963200  ;;  %v140_v0 = vlaneseq  ;;  %s935_s29 = sshll.u32 %s1173_s0, 7  ;;  %s178_s3 = sld [smem:[#allocation3]]  ;;  %v1130_v13 = vmov 0.0   ;;  %v645_v15 = vld [vmem:[%s1262_s6] sm:$0xff]  ;;  %v646_v17 = vld [vmem:[%s1262_s6 + $0x8] sm:$0xff] }
  0x3b   : > { %v1269_v1 = vstv %s935_s29  ;;  %v647_v24 = vld [vmem:[%s1262_s6 + $0x10] sm:$0xff]  ;;  %v648_v33 = vld [vmem:[%s1262_s6 + $0x18] sm:$0xff]  ;;  %v649_v59 = vld [vmem:[%s1262_s6 + $0x20] sm:$0xff]  ;;  %s1363_s4 = scalar_lea.vmem [#allocation7], %s933_s28  ;;  %s977_s5 = sshll.u32 %s1173_s0, 12 }
  0x3c   : > { %v1271_v2 = vshrl.u32 %v140_v0, 7  ;;  %v1273_v3 = vand.u32 127, %v140_v0  ;;  %s852_s7 = sshll.u32 %s1363_s4, 4  ;;  %s1674_s10 = scalar_lea.hbm %s1724_s2, %s977_s5  ;;  %s1676_s7 = int_to_ptr.vmem [resolvable:$true] %s852_s7 }
  0x3d   : > { %s838_s0 = scalar_lea.sflag [#allocation6], %s1256_s27  ;;  %s1059_s15 = scalar_lea.vmem %s1676_s7, 4096 }
  0x3e   : > { %v159_v4 = vadd.s32 %v1269_v1, %v1271_v2  ;;  %v1278_v5 = vadd.s32 128, %v1273_v3  ;;  %v142_v6 = vadd.s32 8, %v1271_v2  ;;  %v143_v7 = vadd.s32 16, %v1271_v2  ;;  %p1060_p6 = scmp.ne.s32.totalorder %s1676_s7, %s1059_s15  ;;  %p1731_p11 = scmp.ne.s32.totalorder %s1728_s22, 0 }
  0x3f   : > { %v144_v8 = vadd.s32 24, %v1271_v2  ;;  %v1284_v9 = vadd.s32 32, %v1271_v2  ;;  %v1287_v10 = vadd.s32 40, %v1271_v2  ;;  %v1313_v28 = vadd.s32 48, %v1271_v2  ;;  %s1131_s17 = smov [#allocation7]  }
  0x40   : > { %v179_v11 = vmul.u32 256, %v159_v4  ;;  %vm549_vm0 = vcmp.eq.s32.totalorder %v159_v4, %v1273_v3  ;;  %vm550_vm1 = vcmp.eq.s32.totalorder %v159_v4, %v1278_v5  ;;  %v160_v12 = vadd.s32 %v1269_v1, %v142_v6  ;;  %s227_s21 = smul.u32 2654435769, %s178_s3  ;;  %p1061_p12 = pnand %p1060_p6, %p1731_p11 }
  0x41   : > { %v1293_v14 = vsel %vm549_vm0, 1.0, %v1130_v13  ;;  %v1297_v16 = vsel %vm550_vm1, 1.0, %v1130_v13  ;;  %v161_v21 = vadd.s32 %v1269_v1, %v143_v7  ;;  %v1326_v37 = vadd.s32 %v1269_v1, %v144_v8  ;;  %s1063_s18 = sshll.u32 %s1131_s17, 4  ;;  %s1064_s18 = int_to_ptr.vmem [resolvable:$false] %s1063_s18 }
  0x42   : > { %v195_v18 = vadd.s32 %v179_v11, %v1273_v3  ;;  %v677_v19 = vsub.f32 %v645_v15, %v1293_v14  ;;  %v196_v20 = vadd.s32 %v179_v11, %v1278_v5  ;;  %v1304_v22 = vstv %s227_s21  ;;  %p1062_p13 = pneg %p1061_p12  ;;  %s1065_s20 = scalar_lea.vmem %s1064_s18, 8192 }
  0x43   : > { %v180_v23 = vmul.u32 256, %v160_v12  ;;  %vm551_vm2 = vcmp.eq.s32.totalorder %v160_v12, %v1273_v3  ;;  %vm552_vm3 = vcmp.eq.s32.totalorder %v160_v12, %v1278_v5  ;;  %v678_v27 = vsub.f32 %v646_v17, %v1297_v16  ;;  %v650_v17 = vld [vmem:[%s1262_s6 + $0x28] sm:$0xff]  ;;  %p1066_p8 = scmp.lt.s32.totalorder %s1676_s7, %s1064_s18  ;;  %p1067_p10 = scmp.lt.s32.totalorder %s1065_s20, %s1059_s15 }
  0x44   : > { %v229_v25 = vadd.s32 %v1304_v22, %v195_v18  ;;  %v230_v26 = vadd.s32 %v1304_v22, %v196_v20  ;;  %v1317_v30 = vsel %vm551_vm2, 1.0, %v1130_v13  ;;  %v1321_v32 = vsel %vm552_vm3, 1.0, %v1130_v13 }
  0x45   : > { %v197_v29 = vadd.s32 %v180_v23, %v1273_v3  ;;  %v198_v31 = vadd.s32 %v180_v23, %v1278_v5  ;;  %v679_v36 = vsub.f32 %v647_v24, %v1317_v30  ;;  %v1328_v38 = vmul.f32 1.4285715, %v677_v19  ;;  %p1068_p0 = por %p1067_p10, %p1066_p8 }
  0x46   : > { %v261_v34 = vshrl.u32 %v229_v25, 16  ;;  %v262_v35 = vshrl.u32 %v230_v26, 16  ;;  %v181_v41 = vmul.u32 256, %v161_v21  ;;  %v710_v44 = vmul.f32 1.4285715, %v678_v27 }
  0x47   : > { %v231_v39 = vadd.s32 %v1304_v22, %v197_v29  ;;  %v232_v40 = vadd.s32 %v1304_v22, %v198_v31  ;;  %v680_v45 = vsub.f32 %v648_v33, %v1321_v32  ;;  %vm553_vm4 = vcmp.eq.s32.totalorder %v161_v21, %v1273_v3  ;;  %p1069_p2 = pnand %p1068_p0, %p1062_p13 }
  0x48   : > { %v293_v42 = vxor.u32 %v261_v34, %v229_v25  ;;  %v294_v43 = vxor.u32 %v262_v35, %v230_v26  ;;  %v199_v48 = vadd.s32 %v181_v41, %v1273_v3  ;;  %v1335_v51 = vmul.f32 1.4285715, %v679_v36 }
  0x49   : > { %v263_v46 = vshrl.u32 %v231_v39, 16  ;;  %v264_v47 = vshrl.u32 %v232_v40, 16  ;;  %v200_v52 = vadd.s32 %v181_v41, %v1278_v5  ;;  %vm554_vm5 = vcmp.eq.s32.totalorder %v161_v21, %v1278_v5 }
  0x4a   : > { %v325_v49 = vmul.u32 2146121005, %v293_v42  ;;  %v326_v50 = vmul.u32 2146121005, %v294_v43  ;;  %v233_v55 = vadd.s32 %v1304_v22, %v199_v48  ;;  %v712_v58 = vmul.f32 1.4285715, %v680_v45 }
  0x4b   : > { %v295_v53 = vxor.u32 %v263_v46, %v231_v39  ;;  %v296_v54 = vxor.u32 %v264_v47, %v232_v40  ;;  %v234_v60 = vadd.s32 %v1304_v22, %v200_v52  ;;  %v1345_v0 = vsel %vm553_vm4, 1.0, %v1130_v13 }
  0x4c   : > { %v357_v56 = vshrl.u32 %v325_v49, 15  ;;  %v358_v57 = vshrl.u32 %v326_v50, 15  ;;  %v265_v63 = vshrl.u32 %v233_v55, 16  ;;  %v1348_v8 = vsel %vm554_vm5, 1.0, %v1130_v13 }
  0x4d   : > { %v327_v61 = vmul.u32 2146121005, %v295_v53  ;;  %v328_v62 = vmul.u32 2146121005, %v296_v54  ;;  %v266_v7 = vshrl.u32 %v234_v60, 16  ;;  %v681_v23 = vsub.f32 %v649_v59, %v1345_v0 }
  0x4e   : > { %v389_v4 = vxor.u32 %v357_v56, %v325_v49  ;;  %v390_v6 = vxor.u32 %v358_v57, %v326_v50  ;;  %v297_v15 = vxor.u32 %v265_v63, %v233_v55  ;;  %v182_v18 = vmul.u32 256, %v1326_v37 }
  0x4f   : > { %v359_v11 = vshrl.u32 %v327_v61, 15  ;;  %v360_v12 = vshrl.u32 %v328_v62, 15  ;;  %v298_v24 = vxor.u32 %v266_v7, %v234_v60  ;;  %v682_v34 = vsub.f32 %v650_v17, %v1348_v8 }
  0x50   : > { %v421_v19 = vmul.u32 2221713035, %v389_v4  ;;  %v422_v20 = vmul.u32 2221713035, %v390_v6  ;;  %v201_v27 = vadd.s32 %v182_v18, %v1273_v3  ;;  %v713_v43 = vmul.f32 1.4285715, %v681_v23 }
  0x51   : > { %v391_v21 = vxor.u32 %v359_v11, %v327_v61  ;;  %v392_v25 = vxor.u32 %v360_v12, %v328_v62  ;;  %v329_v26 = vmul.u32 2146121005, %v297_v15  ;;  %v330_v33 = vmul.u32 2146121005, %v298_v24  ;;  %v652_v24 = vld [vmem:[%s1262_s6 + $0x38] sm:$0xff] }
  0x52   : > { %v453_v29 = vshrl.u32 %v421_v19, 16  ;;  %v454_v31 = vshrl.u32 %v422_v20, 16  ;;  %v235_v40 = vadd.s32 %v1304_v22, %v201_v27  ;;  %v714_v52 = vmul.f32 1.4285715, %v682_v34 }
  0x53   : > { %v423_v35 = vmul.u32 2221713035, %v391_v21  ;;  %v424_v36 = vmul.u32 2221713035, %v392_v25  ;;  %v361_v39 = vshrl.u32 %v329_v26, 15  ;;  %v362_v45 = vshrl.u32 %v330_v33, 15 }
  0x54   : > { %v485_v41 = vxor.u32 %v453_v29, %v421_v19  ;;  %v486_v42 = vxor.u32 %v454_v31, %v422_v20  ;;  %v267_v49 = vshrl.u32 %v235_v40, 16  ;;  %vm555_vm10 = vcmp.eq.s32.totalorder %v1326_v37, %v1273_v3 }
  0x55   : > { %v455_v46 = vshrl.u32 %v423_v35, 16  ;;  %v456_v47 = vshrl.u32 %v424_v36, 16  ;;  %v393_v48 = vxor.u32 %v361_v39, %v329_v26  ;;  %v394_v50 = vxor.u32 %v362_v45, %v330_v33  ;;  %v653_v39 = vld [vmem:[%s1262_s6 + $0x40] sm:$0xff] }
  0x56   : > { %vm517_vm6 = vcmp.ge.u32.totalorder %v485_v41, 1288490189  ;;  %vm518_vm7 = vcmp.ge.u32.totalorder %v486_v42, 1288490189  ;;  %v299_v62 = vxor.u32 %v267_v49, %v235_v40  ;;  %v202_v7 = vadd.s32 %v182_v18, %v1278_v5  ;;  %v654_v49 = vld [vmem:[%s1262_s6 + $0x48] sm:$0xff] }
  0x57   : > { %v741_v53 = vsel %vm517_vm6, %v1328_v38, 0.0  ;;  %v742_v54 = vsel %vm518_vm7, %v710_v44, 0.0  ;;  %v487_v55 = vxor.u32 %v455_v46, %v423_v35  ;;  %v488_v56 = vxor.u32 %v456_v47, %v424_v36 }
  0x58   : > { %v773_v57 = vadd.f32 %v1293_v14, %v741_v53  ;;  %v774_v59 = vadd.f32 %v1297_v16, %v742_v54  ;;  %v425_v60 = vmul.u32 2221713035, %v393_v48  ;;  %v426_v61 = vmul.u32 2221713035, %v394_v50 }
  0x59   : > { %vm519_vm8 = vcmp.ge.u32.totalorder %v487_v55, 1288490189  ;;  %vm520_vm9 = vcmp.ge.u32.totalorder %v488_v56, 1288490189  ;;  %v331_v6 = vmul.u32 2146121005, %v299_v62  ;;  %vm556_vm11 = vcmp.eq.s32.totalorder %v1326_v37, %v1278_v5 }
  0x5a   : > { %805 = vst [vmem:[%s1363_s4] sm:$0xff] %v773_v57  ;;  %806 = vst [vmem:[%s1363_s4 + $0x8] sm:$0xff] %v774_v59  ;;  %v743_v14 = vsel %vm519_vm8, %v1335_v51, 0.0  ;;  %v744_v16 = vsel %vm520_vm9, %v712_v58, 0.0  ;;  %v457_v38 = vshrl.u32 %v425_v60, 16  ;;  %v458_v44 = vshrl.u32 %v426_v61, 16  ;;  %v655_v55 = vld [vmem:[%s1262_s6 + $0x50] sm:$0xff] }
  0x5b   : > { %v775_v63 = vadd.f32 %v1317_v30, %v743_v14  ;;  %v776_v4 = vadd.f32 %v1321_v32, %v744_v16  ;;  %v163_v15 = vadd.s32 %v1269_v1, %v1284_v9  ;;  %v363_v51 = vshrl.u32 %v331_v6, 15  ;;  %v651_v32 = vld [vmem:[%s1262_s6 + $0x30] sm:$0xff] }
  0x5c   : > { %v489_v11 = vxor.u32 %v457_v38, %v425_v60  ;;  %v490_v12 = vxor.u32 %v458_v44, %v426_v61  ;;  %v942_v30 = vsel %vm555_vm10, 1.0, %v1130_v13  ;;  %v236_v58 = vadd.s32 %v1304_v22, %v202_v7 }
  0x5d   : > { %807 = vst [vmem:[%s1363_s4 + $0x10] sm:$0xff] %v775_v63  ;;  %808 = vst [vmem:[%s1363_s4 + $0x18] sm:$0xff] %v776_v4  ;;  %v1384_v17 = vsel %vm556_vm11, 1.0, %v1130_v13  ;;  %v183_v18 = vmul.u32 256, %v163_v15  ;;  %v1388_v9 = vadd.s32 %v1269_v1, %v1287_v10  ;;  %v395_v23 = vxor.u32 %v363_v51, %v331_v6 }
  0x5e   : > { %vm521_vm12 = vcmp.ge.u32.totalorder %v489_v11, 1288490189  ;;  %vm522_vm13 = vcmp.ge.u32.totalorder %v490_v12, 1288490189  ;;  %v268_v37 = vshrl.u32 %v236_v58, 16  ;;  %v683_v26 = vsub.f32 %v651_v32, %v942_v30 }
  0x5f   : > { %v745_v19 = vsel %vm521_vm12, %v713_v43, 0.0  ;;  %v746_v20 = vsel %vm522_vm13, %v714_v52, 0.0  ;;  %v203_v27 = vadd.s32 %v183_v18, %v1273_v3  ;;  %v427_v29 = vmul.u32 2221713035, %v395_v23 }
  0x60   : > { %v777_v21 = vadd.f32 %v1345_v0, %v745_v19  ;;  %v778_v25 = vadd.f32 %v1348_v8, %v746_v20  ;;  %v300_v31 = vxor.u32 %v268_v37, %v236_v58  ;;  %vm557_vm14 = vcmp.eq.s32.totalorder %v163_v15, %v1273_v3 }
  0x61   : > { %v204_v10 = vadd.s32 %v183_v18, %v1278_v5  ;;  %v684_v33 = vsub.f32 %v652_v24, %v1384_v17  ;;  %v237_v34 = vadd.s32 %v1304_v22, %v203_v27  ;;  %vm558_vm15 = vcmp.eq.s32.totalorder %v163_v15, %v1278_v5  ;;  %v656_v27 = vld [vmem:[%s1262_s6 + $0x58] sm:$0xff] }
  0x62   : > { %809 = vst [vmem:[%s1363_s4 + $0x20] sm:$0xff] %v777_v21  ;;  %810 = vst [vmem:[%s1363_s4 + $0x28] sm:$0xff] %v778_v25  ;;  %v184_v0 = vmul.u32 256, %v1388_v9  ;;  %v459_v8 = vshrl.u32 %v427_v29, 16  ;;  %v332_v35 = vmul.u32 2146121005, %v300_v31  ;;  %vm559_vm0 = vcmp.eq.s32.totalorder %v1388_v9, %v1273_v3 }
  0x63   : > { %v1403_v36 = vsel %vm557_vm14, 1.0, %v1130_v13  ;;  %v238_v40 = vadd.s32 %v1304_v22, %v204_v10  ;;  %v715_v41 = vmul.f32 1.4285715, %v683_v26  ;;  %v269_v42 = vshrl.u32 %v237_v34, 16 }
  0x64   : > { %v205_v43 = vadd.s32 %v184_v0, %v1273_v3  ;;  %v491_v45 = vxor.u32 %v459_v8, %v427_v29  ;;  %v364_v46 = vshrl.u32 %v332_v35, 15  ;;  %v1411_v48 = vsel %vm558_vm15, 1.0, %v1130_v13 }
  0x65   : > { %v270_v47 = vshrl.u32 %v238_v40, 16  ;;  %v301_v50 = vxor.u32 %v269_v42, %v237_v34  ;;  %v685_v52 = vsub.f32 %v653_v39, %v1403_v36  ;;  %v1417_v54 = vsel %vm559_vm0, 1.0, %v1130_v13 }
  0x66   : > { %v239_v53 = vadd.s32 %v1304_v22, %v205_v43  ;;  %vm523_vm1 = vcmp.ge.u32.totalorder %v491_v45, 1288490189  ;;  %v396_v56 = vxor.u32 %v364_v46, %v332_v35  ;;  %v716_v57 = vmul.f32 1.4285715, %v684_v33 }
  0x67   : > { %v302_v59 = vxor.u32 %v270_v47, %v238_v40  ;;  %v747_v60 = vsel %vm523_vm1, %v715_v41, 0.0  ;;  %v333_v61 = vmul.u32 2146121005, %v301_v50  ;;  %v686_v62 = vsub.f32 %v654_v49, %v1411_v48  ;;  %v657_v49 = vld [vmem:[%s1262_s6 + $0x60] sm:$0xff] }
  0x68   : > { %v271_v14 = vshrl.u32 %v239_v53, 16  ;;  %v779_v16 = vadd.f32 %v942_v30, %v747_v60  ;;  %v428_v38 = vmul.u32 2221713035, %v396_v56  ;;  %v687_v63 = vsub.f32 %v655_v55, %v1417_v54  ;;  %v658_v56 = vld [vmem:[%s1262_s6 + $0x68] sm:$0xff] }
  0x69   : > { %v334_v44 = vmul.u32 2146121005, %v302_v59  ;;  %v365_v4 = vshrl.u32 %v333_v61, 15  ;;  %v717_v6 = vmul.f32 1.4285715, %v685_v52  ;;  %v206_v11 = vadd.s32 %v184_v0, %v1278_v5 }
  0x6a   : > { %v303_v7 = vxor.u32 %v271_v14, %v239_v53  ;;  %811 = vst [vmem:[%s1363_s4 + $0x30] sm:$0xff] %v779_v16  ;;  %v460_v12 = vshrl.u32 %v428_v38, 16  ;;  %vm560_vm2 = vcmp.eq.s32.totalorder %v1388_v9, %v1278_v5  ;;  %v165_v51 = vadd.s32 %v1269_v1, %v1313_v28 }
  0x6b   : > { %v366_v15 = vshrl.u32 %v334_v44, 15  ;;  %v397_v30 = vxor.u32 %v365_v4, %v333_v61  ;;  %v718_v32 = vmul.f32 1.4285715, %v686_v62  ;;  %v240_v18 = vadd.s32 %v1304_v22, %v206_v11 }
  0x6c   : > { %v335_v58 = vmul.u32 2146121005, %v303_v7  ;;  %v492_v19 = vxor.u32 %v460_v12, %v428_v38  ;;  %v719_v23 = vmul.f32 1.4285715, %v687_v63  ;;  %v185_v37 = vmul.u32 256, %v165_v51 }
  0x6d   : > { %v398_v20 = vxor.u32 %v366_v15, %v334_v44  ;;  %v429_v24 = vmul.u32 2221713035, %v397_v30  ;;  %v272_v25 = vshrl.u32 %v240_v18, 16  ;;  %v1430_v26 = vsel %vm560_vm2, 1.0, %v1130_v13 }
  0x6e   : > { %v367_v21 = vshrl.u32 %v335_v58, 15  ;;  %vm524_vm3 = vcmp.ge.u32.totalorder %v492_v19, 1288490189  ;;  %v207_v28 = vadd.s32 %v185_v37, %v1273_v3  ;;  %vm561_vm4 = vcmp.eq.s32.totalorder %v165_v51, %v1273_v3 }
  0x6f   : > { %v430_v9 = vmul.u32 2221713035, %v398_v20  ;;  %v748_v29 = vsel %vm524_vm3, %v716_v57, 0.0  ;;  %v461_v31 = vshrl.u32 %v429_v24, 16  ;;  %v304_v33 = vxor.u32 %v272_v25, %v240_v18 }
  0x70   : > { %v399_v10 = vxor.u32 %v367_v21, %v335_v58  ;;  %v780_v34 = vadd.f32 %v1384_v17, %v748_v29  ;;  %v688_v8 = vsub.f32 %v656_v27, %v1430_v26  ;;  %v241_v35 = vadd.s32 %v1304_v22, %v207_v28 }
  0x71   : > { %v462_v0 = vshrl.u32 %v430_v9, 16  ;;  %v493_v39 = vxor.u32 %v461_v31, %v429_v24  ;;  %v336_v41 = vmul.u32 2146121005, %v304_v33  ;;  %v208_v42 = vadd.s32 %v185_v37, %v1278_v5  ;;  %v659_v31 = vld [vmem:[%s1262_s6 + $0x70] sm:$0xff] }
  0x72   : > { %v431_v40 = vmul.u32 2221713035, %v399_v10  ;;  %812 = vst [vmem:[%s1363_s4 + $0x38] sm:$0xff] %v780_v34  ;;  %v273_v45 = vshrl.u32 %v241_v35, 16  ;;  %v1443_v46 = vsel %vm561_vm4, 1.0, %v1130_v13  ;;  %vm562_vm5 = vcmp.eq.s32.totalorder %v165_v51, %v1278_v5 }
  0x73   : > { %v494_v43 = vxor.u32 %v462_v0, %v430_v9  ;;  %vm525_vm6 = vcmp.ge.u32.totalorder %v493_v39, 1288490189  ;;  %v368_v47 = vshrl.u32 %v336_v41, 15  ;;  %v242_v50 = vadd.s32 %v1304_v22, %v208_v42 }
  0x74   : > { %v463_v17 = vshrl.u32 %v431_v40, 16  ;;  %v749_v52 = vsel %vm525_vm6, %v717_v6, 0.0  ;;  %v305_v53 = vxor.u32 %v273_v45, %v241_v35  ;;  %v1449_v55 = vsel %vm562_vm5, 1.0, %v1130_v13 }
  0x75   : > { %vm526_vm7 = vcmp.ge.u32.totalorder %v494_v43, 1288490189  ;;  %v781_v57 = vadd.f32 %v1403_v36, %v749_v52  ;;  %v400_v61 = vxor.u32 %v368_v47, %v336_v41  ;;  %v689_v16 = vsub.f32 %v657_v49, %v1443_v46 }
  0x76   : > { %v750_v59 = vsel %vm526_vm7, %v718_v32, 0.0  ;;  %v495_v60 = vxor.u32 %v463_v17, %v431_v40  ;;  %v337_v14 = vmul.u32 2146121005, %v305_v53  ;;  %v274_v38 = vshrl.u32 %v242_v50, 16 }
  0x77   : > { %v782_v62 = vadd.f32 %v1411_v48, %v750_v59  ;;  %813 = vst [vmem:[%s1363_s4 + $0x40] sm:$0xff] %v781_v57  ;;  %v432_v44 = vmul.u32 2221713035, %v400_v61  ;;  %v690_v63 = vsub.f32 %v658_v56, %v1449_v55  ;;  %v148_v4 = vadd.s32 56, %v1271_v2 }
  0x78   : > { %vm527_vm8 = vcmp.ge.u32.totalorder %v495_v60, 1288490189  ;;  %v369_v36 = vshrl.u32 %v337_v14, 15  ;;  %v306_v7 = vxor.u32 %v274_v38, %v242_v50  ;;  %v149_v11 = vadd.s32 64, %v1271_v2  ;;  %v661_v60 = vld [vmem:[%s1262_s6 + $0x80] sm:$0xff] }
  0x79   : > { %814 = vst [vmem:[%s1363_s4 + $0x48] sm:$0xff] %v782_v62  ;;  %v751_v6 = vsel %vm527_vm8, %v719_v23, 0.0  ;;  %v464_v12 = vshrl.u32 %v432_v44, 16  ;;  %v166_v15 = vadd.s32 %v1269_v1, %v148_v4  ;;  %v720_v51 = vmul.f32 1.4285715, %v688_v8  ;;  %v660_v8 = vld [vmem:[%s1262_s6 + $0x78] sm:$0xff] }
  0x7a   : > { %v783_v48 = vadd.f32 %v1417_v54, %v751_v6  ;;  %v401_v30 = vxor.u32 %v369_v36, %v337_v14  ;;  %v721_v32 = vmul.f32 1.4285715, %v689_v16  ;;  %v338_v58 = vmul.u32 2146121005, %v306_v7 }
  0x7b   : > { %v496_v18 = vxor.u32 %v464_v12, %v432_v44  ;;  %v722_v19 = vmul.f32 1.4285715, %v690_v63  ;;  %v186_v20 = vmul.u32 256, %v166_v15  ;;  %vm563_vm9 = vcmp.eq.s32.totalorder %v166_v15, %v1273_v3 }
  0x7c   : > { %815 = vst [vmem:[%s1363_s4 + $0x50] sm:$0xff] %v783_v48  ;;  %v433_v23 = vmul.u32 2221713035, %v401_v30  ;;  %v370_v37 = vshrl.u32 %v338_v58, 15  ;;  %vm564_vm10 = vcmp.eq.s32.totalorder %v166_v15, %v1278_v5  ;;  %v167_v54 = vadd.s32 %v1269_v1, %v149_v11 }
  0x7d   : > { %vm528_vm11 = vcmp.ge.u32.totalorder %v496_v18, 1288490189  ;;  %v209_v24 = vadd.s32 %v186_v20, %v1273_v3  ;;  %v210_v21 = vadd.s32 %v186_v20, %v1278_v5  ;;  %v150_v25 = vadd.s32 72, %v1271_v2 }
  0x7e   : > { %v752_v27 = vsel %vm528_vm11, %v720_v51, 0.0  ;;  %v465_v9 = vshrl.u32 %v433_v23, 16  ;;  %v402_v28 = vxor.u32 %v370_v37, %v338_v58  ;;  %v1470_v29 = vsel %vm563_vm9, 1.0, %v1130_v13 }
  0x7f   : > { %v784_v10 = vadd.f32 %v1430_v26, %v752_v27  ;;  %v243_v33 = vadd.s32 %v1304_v22, %v209_v24  ;;  %v244_v34 = vadd.s32 %v1304_v22, %v210_v21  ;;  %v1477_v0 = vsel %vm564_vm10, 1.0, %v1130_v13 }
  0x80   : > { %v497_v35 = vxor.u32 %v465_v9, %v433_v23  ;;  %v434_v39 = vmul.u32 2221713035, %v402_v28  ;;  %v187_v40 = vmul.u32 256, %v167_v54  ;;  %v1481_v41 = vadd.s32 80, %v1271_v2  ;;  %v663_v28 = vld [vmem:[%s1262_s6 + $0x90] sm:$0xff] }
  0x81   : > { %816 = vst [vmem:[%s1363_s4 + $0x58] sm:$0xff] %v784_v10  ;;  %v275_v42 = vshrl.u32 %v243_v33, 16  ;;  %v691_v43 = vsub.f32 %v659_v31, %v1470_v29  ;;  %v276_v26 = vshrl.u32 %v244_v34, 16  ;;  %vm565_vm12 = vcmp.eq.s32.totalorder %v167_v54, %v1273_v3 }
  0x82   : > { %vm529_vm13 = vcmp.ge.u32.totalorder %v497_v35, 1288490189  ;;  %v466_v45 = vshrl.u32 %v434_v39, 16  ;;  %v692_v17 = vsub.f32 %v660_v8, %v1477_v0  ;;  %v211_v47 = vadd.s32 %v187_v40, %v1273_v3 }
  0x83   : > { %v753_v49 = vsel %vm529_vm13, %v721_v32, 0.0  ;;  %v307_v50 = vxor.u32 %v275_v42, %v243_v33  ;;  %v308_v52 = vxor.u32 %v276_v26, %v244_v34  ;;  %v1489_v53 = vsel %vm565_vm12, 1.0, %v1130_v13 }
  0x84   : > { %v785_v56 = vadd.f32 %v1443_v46, %v753_v49  ;;  %v498_v57 = vxor.u32 %v466_v45, %v434_v39  ;;  %v245_v59 = vadd.s32 %v1304_v22, %v211_v47  ;;  %v212_v61 = vadd.s32 %v187_v40, %v1278_v5 }
  0x85   : > { %v339_v62 = vmul.u32 2146121005, %v307_v50  ;;  %v723_v14 = vmul.f32 1.4285715, %v691_v43  ;;  %v340_v16 = vmul.u32 2146121005, %v308_v52  ;;  %v168_v38 = vadd.s32 %v1269_v1, %v150_v25 }
  0x86   : > { %817 = vst [vmem:[%s1363_s4 + $0x60] sm:$0xff] %v785_v56  ;;  %vm530_vm14 = vcmp.ge.u32.totalorder %v498_v57, 1288490189  ;;  %v277_v44 = vshrl.u32 %v245_v59, 16  ;;  %v246_v63 = vadd.s32 %v1304_v22, %v212_v61  ;;  %vm566_vm15 = vcmp.eq.s32.totalorder %v167_v54, %v1278_v5 }
  0x87   : > { %v754_v46 = vsel %vm530_vm14, %v722_v19, 0.0  ;;  %v371_v4 = vshrl.u32 %v339_v62, 15  ;;  %v372_v6 = vshrl.u32 %v340_v16, 15  ;;  %v693_v36 = vsub.f32 %v661_v60, %v1489_v53  ;;  %v662_v19 = vld [vmem:[%s1262_s6 + $0x88] sm:$0xff]  ;;  %v664_v60 = vld [vmem:[%s1262_s6 + $0x98] sm:$0xff] }
  0x88   : > { %v786_v7 = vadd.f32 %v1449_v55, %v754_v46  ;;  %v309_v11 = vxor.u32 %v277_v44, %v245_v59  ;;  %v278_v48 = vshrl.u32 %v246_v63, 16  ;;  %v188_v12 = vmul.u32 256, %v168_v38 }
  0x89   : > { %v403_v15 = vxor.u32 %v371_v4, %v339_v62  ;;  %v404_v51 = vxor.u32 %v372_v6, %v340_v16  ;;  %v724_v30 = vmul.f32 1.4285715, %v692_v17  ;;  %vm567_vm0 = vcmp.eq.s32.totalorder %v168_v38, %v1273_v3 }
  0x8a   : > { %818 = vst [vmem:[%s1363_s4 + $0x68] sm:$0xff] %v786_v7  ;;  %v341_v32 = vmul.u32 2146121005, %v309_v11  ;;  %v310_v58 = vxor.u32 %v278_v48, %v246_v63  ;;  %v1506_v18 = vsel %vm566_vm15, 1.0, %v1130_v13  ;;  %v213_v55 = vadd.s32 %v188_v12, %v1273_v3 }
  0x8b   : > { %v435_v20 = vmul.u32 2221713035, %v403_v15  ;;  %v436_v23 = vmul.u32 2221713035, %v404_v51  ;;  %v725_v37 = vmul.f32 1.4285715, %v693_v36  ;;  %v214_v24 = vadd.s32 %v188_v12, %v1278_v5 }
  0x8c   : > { %v373_v21 = vshrl.u32 %v341_v32, 15  ;;  %v342_v25 = vmul.u32 2146121005, %v310_v58  ;;  %v247_v27 = vadd.s32 %v1304_v22, %v213_v55  ;;  %v1513_v9 = vsel %vm567_vm0, 1.0, %v1130_v13 }
  0x8d   : > { %v467_v31 = vshrl.u32 %v435_v20, 16  ;;  %v468_v54 = vshrl.u32 %v436_v23, 16  ;;  %v694_v10 = vsub.f32 %v662_v19, %v1506_v18  ;;  %v248_v33 = vadd.s32 %v1304_v22, %v214_v24 }
  0x8e   : > { %v405_v34 = vxor.u32 %v373_v21, %v341_v32  ;;  %v374_v8 = vshrl.u32 %v342_v25, 15  ;;  %v279_v35 = vshrl.u32 %v247_v27, 16  ;;  %vm568_vm1 = vcmp.eq.s32.totalorder %v168_v38, %v1278_v5  ;;  %v665_v21 = vld [vmem:[%s1262_s6 + $0xa0] sm:$0xff] }
  0x8f   : > { %v499_v39 = vxor.u32 %v467_v31, %v435_v20  ;;  %v500_v40 = vxor.u32 %v468_v54, %v436_v23  ;;  %v695_v42 = vsub.f32 %v663_v28, %v1513_v9  ;;  %v280_v43 = vshrl.u32 %v248_v33, 16  ;;  %v666_v28 = vld [vmem:[%s1262_s6 + $0xa8] sm:$0xff] }
  0x90   : > { %v437_v26 = vmul.u32 2221713035, %v405_v34  ;;  %v406_v45 = vxor.u32 %v374_v8, %v342_v25  ;;  %v311_v17 = vxor.u32 %v279_v35, %v247_v27  ;;  %v169_v47 = vadd.s32 %v1269_v1, %v1481_v41 }
  0x91   : > { %vm531_vm2 = vcmp.ge.u32.totalorder %v499_v39, 1288490189  ;;  %vm532_vm3 = vcmp.ge.u32.totalorder %v500_v40, 1288490189  ;;  %v312_v49 = vxor.u32 %v280_v43, %v248_v33  ;;  %v1523_v50 = vsel %vm568_vm1, 1.0, %v1130_v13 }
  0x92   : > { %v755_v52 = vsel %vm531_vm2, %v723_v14, 0.0  ;;  %v756_v56 = vsel %vm532_vm3, %v724_v30, 0.0  ;;  %v469_v57 = vshrl.u32 %v437_v26, 16  ;;  %v438_v59 = vmul.u32 2221713035, %v406_v45 }
  0x93   : > { %v787_v61 = vadd.f32 %v1470_v29, %v755_v52  ;;  %v788_v62 = vadd.f32 %v1477_v0, %v756_v56  ;;  %v343_v16 = vmul.u32 2146121005, %v311_v17  ;;  %v344_v38 = vmul.u32 2146121005, %v312_v49 }
  0x94   : > { %v501_v41 = vxor.u32 %v469_v57, %v437_v26  ;;  %v470_v44 = vshrl.u32 %v438_v59, 16  ;;  %v726_v63 = vmul.f32 1.4285715, %v694_v10  ;;  %v189_v46 = vmul.u32 256, %v169_v47 }
  0x95   : > { %819 = vst [vmem:[%s1363_s4 + $0x70] sm:$0xff] %v787_v61  ;;  %820 = vst [vmem:[%s1363_s4 + $0x78] sm:$0xff] %v788_v62  ;;  %v375_v4 = vshrl.u32 %v343_v16, 15  ;;  %v727_v6 = vmul.f32 1.4285715, %v695_v42  ;;  %v376_v36 = vshrl.u32 %v344_v38, 15  ;;  %v696_v14 = vsub.f32 %v664_v60, %v1523_v50 }
  0x96   : > { %vm533_vm4 = vcmp.ge.u32.totalorder %v501_v41, 1288490189  ;;  %v502_v7 = vxor.u32 %v470_v44, %v438_v59  ;;  %v215_v29 = vadd.s32 %v189_v46, %v1273_v3  ;;  %vm569_vm5 = vcmp.eq.s32.totalorder %v169_v47, %v1273_v3 }
  0x97   : > { %v757_v0 = vsel %vm533_vm4, %v725_v37, 0.0  ;;  %v407_v11 = vxor.u32 %v375_v4, %v343_v16  ;;  %v408_v48 = vxor.u32 %v376_v36, %v344_v38  ;;  %v216_v12 = vadd.s32 %v189_v46, %v1278_v5 }
  0x98   : > { %v789_v15 = vadd.f32 %v1489_v53, %v757_v0  ;;  %vm534_vm6 = vcmp.ge.u32.totalorder %v502_v7, 1288490189  ;;  %v249_v51 = vadd.s32 %v1304_v22, %v215_v29  ;;  %vm570_vm7 = vcmp.eq.s32.totalorder %v169_v47, %v1278_v5 }
  0x99   : > { %v758_v30 = vsel %vm534_vm6, %v726_v63, 0.0  ;;  %v439_v32 = vmul.u32 2221713035, %v407_v11  ;;  %v440_v58 = vmul.u32 2221713035, %v408_v48  ;;  %v250_v19 = vadd.s32 %v1304_v22, %v216_v12  ;;  %v667_v63 = vld [vmem:[%s1262_s6 + $0xb0] sm:$0xff] }
  0x9a   : > { %821 = vst [vmem:[%s1363_s4 + $0x80] sm:$0xff] %v789_v15  ;;  %v790_v55 = vadd.f32 %v1506_v18, %v758_v30  ;;  %v281_v20 = vshrl.u32 %v249_v51, 16  ;;  %v1543_v53 = vsel %vm569_vm5, 1.0, %v1130_v13  ;;  %v152_v23 = vadd.s32 88, %v1271_v2 }
  0x9b   : > { %v471_v37 = vshrl.u32 %v439_v32, 16  ;;  %v472_v24 = vshrl.u32 %v440_v58, 16  ;;  %v282_v25 = vshrl.u32 %v250_v19, 16  ;;  %v1548_v27 = vsel %vm570_vm7, 1.0, %v1130_v13 }
  0x9c   : > { %822 = vst [vmem:[%s1363_s4 + $0x88] sm:$0xff] %v790_v55  ;;  %v728_v31 = vmul.f32 1.4285715, %v696_v14  ;;  %v313_v54 = vxor.u32 %v281_v20, %v249_v51  ;;  %v170_v18 = vadd.s32 %v1269_v1, %v152_v23  ;;  %v153_v10 = vadd.s32 96, %v1271_v2  ;;  %v668_v14 = vld [vmem:[%s1262_s6 + $0xb8] sm:$0xff] }
  0x9d   : > { %v503_v33 = vxor.u32 %v471_v37, %v439_v32  ;;  %v504_v34 = vxor.u32 %v472_v24, %v440_v58  ;;  %v314_v8 = vxor.u32 %v282_v25, %v250_v19  ;;  %v697_v39 = vsub.f32 %v665_v21, %v1543_v53  ;;  %v669_v25 = vld [vmem:[%s1262_s6 + $0xc0] sm:$0xff] }
  0x9e   : > { %v345_v35 = vmul.u32 2146121005, %v313_v54  ;;  %v698_v40 = vsub.f32 %v666_v28, %v1548_v27  ;;  %v190_v42 = vmul.u32 256, %v170_v18  ;;  %v1557_v26 = vadd.s32 %v1269_v1, %v153_v10 }
  0x9f   : > { %vm535_vm8 = vcmp.ge.u32.totalorder %v503_v33, 1288490189  ;;  %vm536_vm9 = vcmp.ge.u32.totalorder %v504_v34, 1288490189  ;;  %v346_v43 = vmul.u32 2146121005, %v314_v8  ;;  %vm571_vm10 = vcmp.eq.s32.totalorder %v170_v18, %v1273_v3 }
  0xa0   : > { %v759_v45 = vsel %vm535_vm8, %v727_v6, 0.0  ;;  %v760_v17 = vsel %vm536_vm9, %v728_v31, 0.0  ;;  %v377_v47 = vshrl.u32 %v345_v35, 15  ;;  %v217_v49 = vadd.s32 %v190_v42, %v1273_v3 }
  0xa1   : > { %v791_v52 = vadd.f32 %v1513_v9, %v759_v45  ;;  %v792_v56 = vadd.f32 %v1523_v50, %v760_v17  ;;  %v378_v57 = vshrl.u32 %v346_v43, 15  ;;  %v218_v61 = vadd.s32 %v190_v42, %v1278_v5  ;;  %v670_v17 = vld [vmem:[%s1262_s6 + $0xc8] sm:$0xff] }
  0xa2   : > { %v409_v59 = vxor.u32 %v377_v47, %v345_v35  ;;  %v251_v60 = vadd.s32 %v1304_v22, %v217_v49  ;;  %vm572_vm11 = vcmp.eq.s32.totalorder %v170_v18, %v1278_v5  ;;  %v729_v62 = vmul.f32 1.4285715, %v697_v39 }
  0xa3   : > { %823 = vst [vmem:[%s1363_s4 + $0x90] sm:$0xff] %v791_v52  ;;  %824 = vst [vmem:[%s1363_s4 + $0x98] sm:$0xff] %v792_v56  ;;  %v410_v16 = vxor.u32 %v378_v57, %v346_v43  ;;  %v191_v9 = vmul.u32 256, %v1557_v26  ;;  %v154_v50 = vadd.s32 104, %v1271_v2  ;;  %v1571_v44 = vsel %vm571_vm10, 1.0, %v1130_v13 }
  0xa4   : > { %v441_v38 = vmul.u32 2221713035, %v409_v59  ;;  %v283_v41 = vshrl.u32 %v251_v60, 16  ;;  %v252_v46 = vadd.s32 %v1304_v22, %v218_v61  ;;  %v730_v6 = vmul.f32 1.4285715, %v698_v40 }
  0xa5   : > { %v442_v4 = vmul.u32 2221713035, %v410_v16  ;;  %v1576_v36 = vsel %vm572_vm11, 1.0, %v1130_v13  ;;  %v219_v7 = vadd.s32 %v191_v9, %v1273_v3  ;;  %vm573_vm12 = vcmp.eq.s32.totalorder %v1557_v26, %v1273_v3 }
  0xa6   : > { %v473_v29 = vshrl.u32 %v441_v38, 16  ;;  %v315_v0 = vxor.u32 %v283_v41, %v251_v60  ;;  %v284_v11 = vshrl.u32 %v252_v46, 16  ;;  %v699_v12 = vsub.f32 %v667_v63, %v1571_v44 }
  0xa7   : > { %v474_v48 = vshrl.u32 %v442_v4, 16  ;;  %v253_v15 = vadd.s32 %v1304_v22, %v219_v7  ;;  %v220_v51 = vadd.s32 %v191_v9, %v1278_v5  ;;  %v700_v19 = vsub.f32 %v668_v14, %v1576_v36 }
  0xa8   : > { %v505_v30 = vxor.u32 %v473_v29, %v441_v38  ;;  %v347_v32 = vmul.u32 2146121005, %v315_v0  ;;  %v316_v58 = vxor.u32 %v284_v11, %v252_v46  ;;  %v1587_v23 = vsel %vm573_vm12, 1.0, %v1130_v13 }
  0xa9   : > { %v506_v55 = vxor.u32 %v474_v48, %v442_v4  ;;  %v285_v20 = vshrl.u32 %v253_v15, 16  ;;  %v254_v37 = vadd.s32 %v1304_v22, %v220_v51  ;;  %vm574_vm14 = vcmp.eq.s32.totalorder %v1557_v26, %v1278_v5 }
  0xaa   : > { %vm537_vm13 = vcmp.ge.u32.totalorder %v505_v30, 1288490189  ;;  %v379_v24 = vshrl.u32 %v347_v32, 15  ;;  %v348_v21 = vmul.u32 2146121005, %v316_v58  ;;  %v701_v39 = vsub.f32 %v669_v25, %v1587_v23  ;;  %v671_v58 = vld [vmem:[%s1262_s6 + $0xd0] sm:$0xff] }
  0xab   : > { %v761_v28 = vsel %vm537_vm13, %v729_v62, 0.0  ;;  %vm538_vm15 = vcmp.ge.u32.totalorder %v506_v55, 1288490189  ;;  %v317_v31 = vxor.u32 %v285_v20, %v253_v15  ;;  %v286_v54 = vshrl.u32 %v254_v37, 16 }
  0xac   : > { %v793_v18 = vadd.f32 %v1543_v53, %v761_v28  ;;  %v762_v10 = vsel %vm538_vm15, %v730_v6, 0.0  ;;  %v411_v33 = vxor.u32 %v379_v24, %v347_v32  ;;  %v380_v34 = vshrl.u32 %v348_v21, 15 }
  0xad   : > { %v794_v8 = vadd.f32 %v1548_v27, %v762_v10  ;;  %v349_v35 = vmul.u32 2146121005, %v317_v31  ;;  %v318_v40 = vxor.u32 %v286_v54, %v254_v37  ;;  %v1601_v45 = vsel %vm574_vm14, 1.0, %v1130_v13 }
  0xae   : > { %825 = vst [vmem:[%s1363_s4 + $0xa0] sm:$0xff] %v793_v18  ;;  %v443_v42 = vmul.u32 2221713035, %v411_v33  ;;  %v412_v43 = vxor.u32 %v380_v34, %v348_v21  ;;  %v172_v53 = vadd.s32 %v1269_v1, %v154_v50  ;;  %v731_v47 = vmul.f32 1.4285715, %v699_v12 }
  0xaf   : > { %826 = vst [vmem:[%s1363_s4 + $0xa8] sm:$0xff] %v794_v8  ;;  %v381_v49 = vshrl.u32 %v349_v35, 15  ;;  %v350_v27 = vmul.u32 2146121005, %v318_v40  ;;  %v732_v57 = vmul.f32 1.4285715, %v700_v19  ;;  %v702_v16 = vsub.f32 %v670_v17, %v1601_v45 }
  0xb0   : > { %v475_v52 = vshrl.u32 %v443_v42, 16  ;;  %v444_v56 = vmul.u32 2221713035, %v412_v43  ;;  %v192_v59 = vmul.u32 256, %v172_v53  ;;  %v733_v61 = vmul.f32 1.4285715, %v701_v39 }
  0xb1   : > { %v413_v60 = vxor.u32 %v381_v49, %v349_v35  ;;  %v382_v62 = vshrl.u32 %v350_v27, 15  ;;  %v155_v41 = vadd.s32 112, %v1271_v2  ;;  %vm575_vm0 = vcmp.eq.s32.totalorder %v172_v53, %v1273_v3  ;;  %v672_v8 = vld [vmem:[%s1262_s6 + $0xd8] sm:$0xff] }
  0xb2   : > { %v507_v9 = vxor.u32 %v475_v52, %v443_v42  ;;  %v476_v26 = vshrl.u32 %v444_v56, 16  ;;  %v221_v38 = vadd.s32 %v192_v59, %v1273_v3  ;;  %v222_v46 = vadd.s32 %v192_v59, %v1278_v5 }
  0xb3   : > { %v445_v50 = vmul.u32 2221713035, %v413_v60  ;;  %v414_v63 = vxor.u32 %v382_v62, %v350_v27  ;;  %v156_v14 = vadd.s32 120, %v1271_v2  ;;  %v1616_v15 = vsel %vm575_vm0, 1.0, %v1130_v13 }
  0xb4   : > { %vm539_vm1 = vcmp.ge.u32.totalorder %v507_v9, 1288490189  ;;  %v508_v4 = vxor.u32 %v476_v26, %v444_v56  ;;  %v255_v6 = vadd.s32 %v1304_v22, %v221_v38  ;;  %v256_v11 = vadd.s32 %v1304_v22, %v222_v46 }
  0xb5   : > { %v763_v7 = vsel %vm539_vm1, %v731_v47, 0.0  ;;  %v477_v29 = vshrl.u32 %v445_v50, 16  ;;  %v446_v0 = vmul.u32 2221713035, %v414_v63  ;;  %v734_v55 = vmul.f32 1.4285715, %v702_v16 }
  0xb6   : > { %v795_v48 = vadd.f32 %v1571_v44, %v763_v7  ;;  %vm540_vm2 = vcmp.ge.u32.totalorder %v508_v4, 1288490189  ;;  %v287_v12 = vshrl.u32 %v255_v6, 16  ;;  %v288_v19 = vshrl.u32 %v256_v11, 16 }
  0xb7   : > { %v764_v51 = vsel %vm540_vm2, %v732_v57, 0.0  ;;  %v509_v30 = vxor.u32 %v477_v29, %v445_v50  ;;  %v478_v32 = vshrl.u32 %v446_v0, 16  ;;  %v173_v37 = vadd.s32 %v1269_v1, %v155_v41  ;;  %v673_v57 = vld [vmem:[%s1262_s6 + $0xe0] sm:$0xff] }
  0xb8   : > { %827 = vst [vmem:[%s1363_s4 + $0xb0] sm:$0xff] %v795_v48  ;;  %v796_v2 = vadd.f32 %v1576_v36, %v764_v51  ;;  %v319_v20 = vxor.u32 %v287_v12, %v255_v6  ;;  %v320_v24 = vxor.u32 %v288_v19, %v256_v11  ;;  %vm576_vm4 = vcmp.eq.s32.totalorder %v172_v53, %v1278_v5  ;;  %v674_v51 = vld [vmem:[%s1262_s6 + $0xe8] sm:$0xff] }
  0xb9   : > { %vm541_vm3 = vcmp.ge.u32.totalorder %v509_v30, 1288490189  ;;  %v510_v44 = vxor.u32 %v478_v32, %v446_v0  ;;  %v703_v28 = vsub.f32 %v671_v58, %v1616_v15  ;;  %v193_v31 = vmul.u32 256, %v173_v37 }
  0xba   : > { %828 = vst [vmem:[%s1363_s4 + $0xb8] sm:$0xff] %v796_v2  ;;  %v765_v21 = vsel %vm541_vm3, %v733_v61, 0.0  ;;  %v351_v25 = vmul.u32 2146121005, %v319_v20  ;;  %v352_v36 = vmul.u32 2146121005, %v320_v24  ;;  %v1627_v18 = vadd.s32 %v1269_v1, %v156_v14 }
  0xbb   : > { %v797_v54 = vadd.f32 %v1587_v23, %v765_v21  ;;  %vm542_vm5 = vcmp.ge.u32.totalorder %v510_v44, 1288490189  ;;  %v963_v34 = vsel %vm576_vm4, 1.0, %v1130_v13  ;;  %v223_v35 = vadd.s32 %v193_v31, %v1273_v3 }
  0xbc   : > { %v766_v10 = vsel %vm542_vm5, %v734_v55, 0.0  ;;  %v383_v33 = vshrl.u32 %v351_v25, 15  ;;  %v384_v40 = vshrl.u32 %v352_v36, 15  ;;  %v224_v23 = vadd.s32 %v193_v31, %v1278_v5 }
  0xbd   : > { %829 = vst [vmem:[%s1363_s4 + $0xc0] sm:$0xff] %v797_v54  ;;  %v798_v39 = vadd.f32 %v1601_v45, %v766_v10  ;;  %v257_v43 = vadd.s32 %v1304_v22, %v223_v35  ;;  %vm577_vm6 = vcmp.eq.s32.totalorder %v173_v37, %v1273_v3  ;;  %v704_v17 = vsub.f32 %v672_v8, %v963_v34  ;;  %v676_v10 = vld [vmem:[%s1262_s6 + $0xf8] sm:$0xff] }
  0xbe   : > { %v415_v42 = vxor.u32 %v383_v33, %v351_v25  ;;  %v416_v1 = vxor.u32 %v384_v40, %v352_v36  ;;  %v258_v53 = vadd.s32 %v1304_v22, %v224_v23  ;;  %v194_v47 = vmul.u32 256, %v1627_v18 }
  0xbf   : > { %830 = vst [vmem:[%s1363_s4 + $0xc8] sm:$0xff] %v798_v39  ;;  %v735_v27 = vmul.f32 1.4285715, %v703_v28  ;;  %v289_v52 = vshrl.u32 %v257_v43, 16  ;;  %v1641_v56 = vsel %vm577_vm6, 1.0, %v1130_v13  ;;  %vm578_vm7 = vcmp.eq.s32.totalorder %v173_v37, %v1278_v5  ;;  %v675_v28 = vld [vmem:[%s1262_s6 + $0xf0] sm:$0xff] }
  0xc0   : > { %v447_v49 = vmul.u32 2221713035, %v415_v42  ;;  %v448_v45 = vmul.u32 2221713035, %v416_v1  ;;  %v290_v59 = vshrl.u32 %v258_v53, 16  ;;  %v225_v60 = vadd.s32 %v194_v47, %v1273_v3 }
  0xc1   : > { %v321_v62 = vxor.u32 %v289_v52, %v257_v43  ;;  %v226_v16 = vadd.s32 %v194_v47, %v1278_v5  ;;  %v736_v26 = vmul.f32 1.4285715, %v704_v17  ;;  %v705_v46 = vsub.f32 %v673_v57, %v1641_v56 }
  0xc2   : > { %v479_v61 = vshrl.u32 %v447_v49, 16  ;;  %v480_v9 = vshrl.u32 %v448_v45, 16  ;;  %v322_v38 = vxor.u32 %v290_v59, %v258_v53  ;;  %v259_v41 = vadd.s32 %v1304_v22, %v225_v60 }
  0xc3   : > { %v353_v63 = vmul.u32 2146121005, %v321_v62  ;;  %v260_v4 = vadd.s32 %v1304_v22, %v226_v16  ;;  %v965_v7 = vsel %vm578_vm7, 1.0, %v1130_v13  ;;  %vm579_vm9 = vcmp.eq.s32.totalorder %v1627_v18, %v1273_v3 }
  0xc4   : > { %v511_v50 = vxor.u32 %v479_v61, %v447_v49  ;;  %v512_v6 = vxor.u32 %v480_v9, %v448_v45  ;;  %v354_v14 = vmul.u32 2146121005, %v322_v38  ;;  %v291_v29 = vshrl.u32 %v259_v41, 16 }
  0xc5   : > { %v385_v0 = vshrl.u32 %v353_v63, 15  ;;  %v292_v11 = vshrl.u32 %v260_v4, 16  ;;  %vm580_vm11 = vcmp.eq.s32.totalorder %v1627_v18, %v1278_v5  ;;  %v706_v44 = vsub.f32 %v674_v51, %v965_v7 }
  0xc6   : > { %vm543_vm8 = vcmp.ge.u32.totalorder %v511_v50, 1288490189  ;;  %vm544_vm10 = vcmp.ge.u32.totalorder %v512_v6, 1288490189  ;;  %v386_v12 = vshrl.u32 %v354_v14, 15  ;;  %v323_v30 = vxor.u32 %v291_v29, %v259_v41 }
  0xc7   : > { %v767_v48 = vsel %vm543_vm8, %v735_v27, 0.0  ;;  %v768_v32 = vsel %vm544_vm10, %v736_v26, 0.0  ;;  %v417_v58 = vxor.u32 %v385_v0, %v353_v63  ;;  %v324_v19 = vxor.u32 %v292_v11, %v260_v4 }
  0xc8   : > { %v799_v22 = vadd.f32 %v1616_v15, %v767_v48  ;;  %v800_v2 = vadd.f32 %v963_v34, %v768_v32  ;;  %v418_v55 = vxor.u32 %v386_v12, %v354_v14  ;;  %v355_v20 = vmul.u32 2146121005, %v323_v30 }
  0xc9   : > { %v449_v37 = vmul.u32 2221713035, %v417_v58  ;;  %v356_v24 = vmul.u32 2146121005, %v324_v19  ;;  %v966_v15 = vsel %vm579_vm9, 1.0, %v1130_v13  ;;  %v967_v36 = vsel %vm580_vm11, 1.0, %v1130_v13 }
  0xca   : > { %831 = vst [vmem:[%s1363_s4 + $0xd0] sm:$0xff] %v799_v22  ;;  %832 = vst [vmem:[%s1363_s4 + $0xd8] sm:$0xff] %v800_v2  ;;  %v450_v21 = vmul.u32 2221713035, %v418_v55  ;;  %v387_v25 = vshrl.u32 %v355_v20, 15  ;;  %v707_v39 = vsub.f32 %v675_v28, %v966_v15  ;;  %v708_v43 = vsub.f32 %v676_v10, %v967_v36 }
  0xcb   : > { %v481_v31 = vshrl.u32 %v449_v37, 16  ;;  %v388_v54 = vshrl.u32 %v356_v24, 15  ;;  %v737_v33 = vmul.f32 1.4285715, %v705_v46  ;;  %v738_v35 = vmul.f32 1.4285715, %v706_v44 }
  0xcc   : > { %v482_v5 = vshrl.u32 %v450_v21, 16  ;;  %v419_v34 = vxor.u32 %v387_v25, %v355_v20  ;;  %v739_v53 = vmul.f32 1.4285715, %v707_v39  ;;  %v740_v52 = vmul.f32 1.4285715, %v708_v43 }
  0xcd   : > { %v513_v8 = vxor.u32 %v481_v31, %v449_v37  ;;  %v420_v40 = vxor.u32 %v388_v54, %v356_v24 }
  0xce   : > { %v514_v23 = vxor.u32 %v482_v5, %v450_v21  ;;  %v451_v42 = vmul.u32 2221713035, %v419_v34 }
  0xcf   : > { %vm545_vm12 = vcmp.ge.u32.totalorder %v513_v8, 1288490189  ;;  %v452_v3 = vmul.u32 2221713035, %v420_v40 }
  0xd0   : > { %v769_v18 = vsel %vm545_vm12, %v737_v33, 0.0  ;;  %vm546_vm13 = vcmp.ge.u32.totalorder %v514_v23, 1288490189  ;;  %v483_v13 = vshrl.u32 %v451_v42, 16 }
  0xd1   : > { %v801_v1 = vadd.f32 %v1641_v56, %v769_v18  ;;  %v770_v17 = vsel %vm546_vm13, %v738_v35, 0.0  ;;  %v484_v47 = vshrl.u32 %v452_v3, 16 }
  0xd2   : > { %v802_v49 = vadd.f32 %v965_v7, %v770_v17  ;;  %v515_v27 = vxor.u32 %v483_v13, %v451_v42 }
  0xd3   : > { %833 = vst [vmem:[%s1363_s4 + $0xe0] sm:$0xff] %v801_v1  ;;  %v516_v45 = vxor.u32 %v484_v47, %v452_v3 }
  0xd4   : > { %834 = vst [vmem:[%s1363_s4 + $0xe8] sm:$0xff] %v802_v49  ;;  %vm547_vm14 = vcmp.ge.u32.totalorder %v515_v27, 1288490189 }
  0xd5   : > { %v771_v57 = vsel %vm547_vm14, %v739_v53, 0.0  ;;  %vm548_vm15 = vcmp.ge.u32.totalorder %v516_v45, 1288490189 }
  0xd6   : > { %v803_v59 = vadd.f32 %v966_v15, %v771_v57  ;;  %v772_v56 = vsel %vm548_vm15, %v740_v52, 0.0 }
  0xd7   : > { %v804_v60 = vadd.f32 %v967_v36, %v772_v56 }
  0xd8   : > { %835 = vst [vmem:[%s1363_s4 + $0xf0] sm:$0xff] %v803_v59 }
  0xd9   : > { %836 = vst [vmem:[%s1363_s4 + $0xf8] sm:$0xff] %v804_v60 }
  0xda   : > { %1072 = shalt.err (!%p1069_p2)
}
  0xdb   : > { %s1073_s24 = scalar_lea.hbm %s1674_s10, 4096  ;;  %s1077_s28 = scalar_lea.hbm %s1724_s2, 8192 }
  0xdc   : > { %p1074_p4 = scmp.ne.s32.totalorder %s1674_s10, %s1073_s24  ;;  %p1078_p9 = scmp.lt.u32.totalorder %s1674_s10, %s1724_s2 }
  0xdd   : > { %p1079_p1 = scmp.lt.u32.totalorder %s1077_s28, %s1073_s24  ;;  %p1081_p6 = scmp.lt.u32.totalorder %s1073_s24, %s1674_s10 }
  0xde   : > { %p1075_p5 = pnand %p1074_p4, %p1731_p11 }
  0xdf   : > { %p1080_p3 = por %p1079_p1, %p1078_p9 }
  0xe0   : > { %p1076_p7 = pneg %p1075_p5 }
  0xe1   : > { %p1082_p12 = por %p1081_p6, %p1080_p3 }
  0xe3   : > { %p1083_p13 = pnand %p1082_p12, %p1076_p7 }
  0xe5   : > { %1086 = shalt.err (!%p1083_p13)
}
  0xe6   : > { %s1132_s29 = smov 256   ;;  %s1133_s3 = smov 16  }
  0xe7   : > { %980 = dma.vmem_to_hbm [thread:$0]  (%p1731_p11), %s1676_s7, 4096, %s1674_s10, %s838_s0, %s1132_s29, %s1132_s29, %s1133_s3  }
  0xe8 PF: > { %s867_s21 = sand.u32 1, %s1113_s11   ;;  %p1732_p8 = scmp.ne.s32.totalorder %s1729_s23, 0 }
  0xe9   : > { %p1733_p10 = scmp.ge.s32.totalorder %s1125_s14, 2  ;;  %s868_s4 = scalar_lea.sflag [#allocation6], %s867_s21 }
  0xeb   : > { %p987_p0 = pnand %p1733_p10, %p1732_p8 }
  0xed   : > { %1108 = dma.done.wait (!%p987_p0), %s868_s4, 4096  }
  0xee   : > { %1110 = vsyncadd (!%p987_p0), %s868_s4, 4294963200  ;;  %p16_p2 = scmp.ge.s32.totalorder %s1177_s16, 4   ;;  %s1734_s11 = smov %s1117_s12 }
  0xef   : > { %s1735_s12 = smov %s1121_s13  ;;  %s1736_s13 = smov %s1189_s19 }
  0xf0   : > { %s1737_s14 = smov %s1177_s16  ;;  %18 = sbr.rel (!%p16_p2) target bundleno = 7 (0x7), region = 69 }
  0xf7   :  { %873 = vsyncpa [#allocation5], 1 }
  0xf8   :  { %875 = vsyncpa [#allocation5 + $0x1], 1 }
  0xf9   :  { %876 = vsyncpa [#allocation6], 1 }
  0xfa   :  { %878 = vsyncpa [#allocation6 + $0x1], 1 }

</bundles_post_ra>
